<compile_context>
chip_gen: v5e
topology: v5e:2x2
jax: 0.10.0
libtpu: 0.0.40
codegen_flags: <defaults>
</compile_context>

<pallas_src>
import jax
import jax.numpy as jnp
from jax.experimental import pallas as pl
from jax.experimental.pallas import tpu as pltpu


_LANES = 1024                      # lane-dense last dim (multiple of 128)
_TARGET_BLOCK_BYTES = 2 * 1024 * 1024   # ~2 MiB per block buffer


def _proliferation_kernel(u_ref, o_ref):
    u = u_ref[...]
    o_ref[...] = u * (1 - u)


def _round_up(x: int, m: int) -> int:
    return (x + m - 1) // m * m


def _pick_block_rows(dtype) -> int:
    itemsize = jnp.dtype(dtype).itemsize
    rows = _TARGET_BLOCK_BYTES // (_LANES * itemsize)
    # Multiple of 256 rows: sublane-aligned for every packing (f32..int4).
    rows = max(256, (rows // 256) * 256)
    return rows


def proliferation_term(u: jax.Array) -> jax.Array:
    """Elementwise logistic-growth proliferation term u * (1 - u)."""
    orig_shape = u.shape
    dtype = u.dtype
    n = u.size
    if n == 0:
        return u

    flat = u.reshape(-1)

    # Pad only if the element count is not a multiple of the lane width
    # (0 * (1 - 0) = 0 in the pad region; tail sliced off afterwards).
    n_pad = _round_up(n, _LANES)
    if n_pad != n:
        flat = jnp.pad(flat, (0, n_pad - n))
    rows = n_pad // _LANES
    u2d = flat.reshape(rows, _LANES)

    block_rows = _pick_block_rows(dtype)
    if rows <= block_rows:
        # Single block covering the whole array: no (8,128) constraint applies.
        block_rows = rows
    num_blocks = pl.cdiv(rows, block_rows)

    itemsize = jnp.dtype(dtype).itemsize
    out2d = pl.pallas_call(
        _proliferation_kernel,
        out_shape=jax.ShapeDtypeStruct((rows, _LANES), dtype),
        grid=(num_blocks,),
        in_specs=[pl.BlockSpec((block_rows, _LANES), lambda i: (i, 0))],
        out_specs=pl.BlockSpec((block_rows, _LANES), lambda i: (i, 0)),
        compiler_params=pltpu.CompilerParams(
            dimension_semantics=("parallel",)
        ),
        cost_estimate=pl.CostEstimate(
            flops=2 * n,
            transcendentals=0,
            bytes_accessed=2 * n * itemsize,
        ),
    )(u2d)

    if n_pad != n:
        return out2d.reshape(-1)[:n].reshape(orig_shape)
    return out2d.reshape(orig_shape)


if __name__ == "__main__":
    key = jax.random.PRNGKey(0)
    k0, k1, k2, k3 = jax.random.split(key, 4)

    # 1) Small NCHW field (B, C, H, W) — single lane-dense block.
    x = jax.random.uniform(k0, (2, 4, 16, 16), dtype=jnp.float32)
    y = proliferation_term(x)
    jax.block_until_ready(y)
    assert y.shape == x.shape and y.dtype == x.dtype
    assert jnp.allclose(y, x * (1.0 - x), atol=1e-6, rtol=1e-6)

    # 2) Larger input exercising the multi-block pipelined path (1M elems).
    x_big = jax.random.uniform(k1, (1, 8, 256, 512), dtype=jnp.float32)
    y_big = proliferation_term(x_big)
    jax.block_until_ready(y_big)
    assert jnp.allclose(y_big, x_big * (1.0 - x_big), atol=1e-6, rtol=1e-6)

    # 3) Ragged element count (not a multiple of 1024) — pad/slice path.
    x_rag = jax.random.uniform(k2, (3, 5, 7, 11), dtype=jnp.float32)
    y_rag = proliferation_term(x_rag)
    jax.block_until_ready(y_rag)
    assert y_rag.shape == x_rag.shape
    assert jnp.allclose(y_rag, x_rag * (1.0 - x_rag), atol=1e-6, rtol=1e-6)

    # 4) bf16 input (different block-row selection, same semantics).
    x_bf = jax.random.uniform(k3, (2, 4, 16, 16), dtype=jnp.bfloat16)
    y_bf = proliferation_term(x_bf)
    jax.block_until_ready(y_bf)
    assert y_bf.dtype == jnp.bfloat16
    assert jnp.allclose(y_bf.astype(jnp.float32),
                        (x_bf * (1 - x_bf)).astype(jnp.float32),
                        atol=1e-2, rtol=1e-2)

    print("KERNEL_OK")
</pallas_src>

<mosaic_0001>
module attributes {stable_mosaic.version = 11 : i64} {
  func.func @_proliferation_kernel(%arg0: i32, %arg1: memref<2x1024xf32, #tpu.memory_space<vmem>>, %arg2: memref<2x1024xf32, #tpu.memory_space<vmem>>) attributes {dimension_semantics = [#tpu.dimension_semantics<parallel>], iteration_bounds = array<i64: 1>, scalar_prefetch = 0 : i64, scratch_operands = 0 : i64, tpu.core_type = #tpu.core_type<tc>, window_params = [{transform_indices = @transform_0, window_bounds = array<i64: 2, 1024>}, {transform_indices = @transform_1, window_bounds = array<i64: 2, 1024>}]} {
    %c0 = arith.constant 0 : index
    %c0_0 = arith.constant 0 : index
    %0 = vector.load %arg1[%c0, %c0_0] : memref<2x1024xf32, #tpu.memory_space<vmem>>, vector<2x1024xf32>
    %cst = arith.constant 1.000000e+00 : f32
    %1 = vector.broadcast %cst : f32 to vector<2x1024xf32>
    %2 = arith.subf %1, %0 : vector<2x1024xf32>
    %3 = arith.mulf %0, %2 : vector<2x1024xf32>
    %c0_1 = arith.constant 0 : index
    %c0_2 = arith.constant 0 : index
    %4 = vector.load %arg2[%c0_1, %c0_2] : memref<2x1024xf32, #tpu.memory_space<vmem>>, vector<2x1024xf32>
    tpu.vector_store %arg2[%c0_1, %c0_2], %3 {strides = array<i32>} : memref<2x1024xf32, #tpu.memory_space<vmem>>, vector<2x1024xf32>,
    return
  }
  func.func @transform_0(%arg0: i32) -> (i32, i32) {
    %c0_i32 = arith.constant 0 : i32
    %c0_i32_0 = arith.constant 0 : i32
    return %arg0, %c0_i32 : i32, i32
  }
  func.func @transform_1(%arg0: i32) -> (i32, i32) {
    %c0_i32 = arith.constant 0 : i32
    %c0_i32_0 = arith.constant 0 : i32
    return %arg0, %c0_i32 : i32, i32
  }
}

</mosaic_0001>

<bundles_post_ra>
// kernel: tpu_custom_call.1
= control target key start
LH: loop header
LB: loop body
LE: loop exit
PB: predicated region body
PF: predicated region fallthrough
CT: control target
= control target key end

     0   :  { %6 = vsyncpa [#allocation3], 0  ;;  %s120_s0 = inlined_call_operand.hbm [shape: f32[2,1024], index: 0, kind: input, shape index: {}]   ;;  %s121_s1 = inlined_call_operand.hbm [shape: f32[2,1024], index: 1, kind: output, shape index: {}]  }
   0x1   :  { %7 = vsyncpa [#allocation4], 0  ;;  %s13_s8 = sshll.u32 %s120_s0, 4  ;;  %s102_s9 = smov [#allocation2]   ;;  %s14_s8 = int_to_ptr.hbm [resolvable:$true] %s13_s8 }
   0x2   :  { %s15_s10 = sshll.u32 %s102_s9, 4  ;;  %s16_s10 = int_to_ptr.vmem [resolvable:$true] %s15_s10 }
   0x3   :  { %18 = dma.hbm_to_vmem [thread:$0]  %s14_s8, 256, %s16_s10, [#allocation3]  }
   0x4   :  { %98 = dma.done.wait [#allocation3], 256  }
   0x5   :  { %99 = vsyncadd [#allocation3], 4294967040  ;;  %v23_v0 = vld [vmem:[#allocation2] sm:$0xff]  ;;  %v24_v1 = vld [vmem:[#allocation2 + $0x8] sm:$0xff]  ;;  %s103_s11 = smov [#allocation5]   ;;  %s38_s15 = sshll.u32 %s121_s1, 4  ;;  %s39_s15 = int_to_ptr.hbm [resolvable:$true] %s38_s15 }
   0x6   :  { %v25_v2 = vsub.f32 1.0, %v23_v0  ;;  %v26_v3 = vsub.f32 1.0, %v24_v1  ;;  %s36_s12 = sshll.u32 %s103_s11, 4  ;;  %s37_s12 = int_to_ptr.vmem [resolvable:$true] %s36_s12 }
   0x8   :  { %v27_v4 = vmul.f32 %v25_v2, %v23_v0  ;;  %v28_v5 = vmul.f32 %v26_v3, %v24_v1 }
   0xa   :  { %29 = vst [vmem:[#allocation5] sm:$0xff] %v27_v4 }
   0xb   :  { %30 = vst [vmem:[#allocation5 + $0x8] sm:$0xff] %v28_v5 }
   0xc   :  { %41 = dma.vmem_to_hbm [thread:$0]  %s37_s12, 256, %s39_s15, [#allocation4]  }
   0xd   :  { %100 = dma.done.wait [#allocation4], 256  }
   0xe   :  { %101 = vsyncadd [#allocation4], 4294967040 }
   0xf   :  { %46 = vsyncpa [#allocation3], 1 }
  0x10   :  { %47 = vsyncpa [#allocation4], 1 }

</bundles_post_ra>
